<compile_context>
chip_gen: v7x
topology: tpu7x:2x2x1
jax: 0.10.0
libtpu: 0.0.40
codegen_flags: <defaults>
</compile_context>

<pallas_src>
import functools
import math

import jax
import jax.numpy as jnp
from jax.experimental import pallas as pl
from jax.experimental.pallas import tpu as pltpu


_VMEM_LIMIT_BYTES = 48 * 1024 * 1024    # fits v7x (64 MiB physical), plenty on v5e/v6e
_VMEM_BUDGET_BYTES = 40 * 1024 * 1024   # headroom for temporaries / internal scratch


def _round_up(x, m):
    return ((x + m - 1) // m) * m


def _mm(a, b):
    # full-precision f32 matmul for host-side preprocessing / references
    return jnp.dot(a, b, precision=jax.lax.Precision.HIGHEST)


# ------------------------------ Pallas kernels --------------------------------
def gcn_fullrow_kernel(a_ref, z_ref, w_ref, b_ref, out_ref, *, relu):
    """out[i] = act((A[i,:] @ Z) @ W + b) for one full row stripe.

      a_ref : [tm, n_pad]   bf16  full-row stripe of the normalized adjacency
      z_ref : [n_pad, Fin]  bf16  node features, VMEM-resident across the grid
      w_ref : [Fin, Fout]   bf16  layer weight, VMEM-resident
      b_ref : [1, Fout]     f32   bias, VMEM-resident
      out   : [tm, Fout]          result for row stripe i
    """
    agg = jnp.dot(a_ref[...], z_ref[...], preferred_element_type=jnp.float32)
    y = jnp.dot(agg.astype(jnp.bfloat16), w_ref[...],
                preferred_element_type=jnp.float32) + b_ref[...]
    if relu:
        y = jnp.maximum(y, 0.0)
    out_ref[...] = y.astype(out_ref.dtype)


def gcn_tiledk_kernel(a_ref, z_ref, w_ref, b_ref, out_ref, acc_ref, *, relu):
    """Fallback for very large graphs: out[i] = act((sum_k A[i,k] @ Z[k]) @ W + b).

    grid = (row stripe i [parallel], A column block k [arbitrary/reduction]).
    Z stays VMEM-resident; the k-th block is sliced in-kernel with pl.ds.
    """
    k = pl.program_id(1)
    tk = a_ref.shape[1]

    @pl.when(k == 0)
    def _():
        acc_ref[...] = jnp.zeros_like(acc_ref)

    start = pl.multiple_of(k * tk, tk)
    acc_ref[...] += jnp.dot(a_ref[...], z_ref[pl.ds(start, tk), :],
                            preferred_element_type=jnp.float32)

    @pl.when(k == pl.num_programs(1) - 1)
    def _():
        y = jnp.dot(acc_ref[...].astype(jnp.bfloat16), w_ref[...],
                    preferred_element_type=jnp.float32) + b_ref[...]
        if relu:
            y = jnp.maximum(y, 0.0)
        out_ref[...] = y.astype(out_ref.dtype)


def _gcn_layer(a_p, z_p, w_p, b_p, *, relu, out_dtype, tm=256, tk=None,
               force_path=None):
    n_pad = a_p.shape[0]
    fin = z_p.shape[1]
    fout = w_p.shape[1]
    out_bytes = jnp.dtype(out_dtype).itemsize

    cost = pl.CostEstimate(
        flops=2 * n_pad * n_pad * fin + 2 * n_pad * fin * fout,
        transcendentals=0,
        bytes_accessed=(n_pad * n_pad * 2 + n_pad * fin * 2
                        + fin * fout * 2 + fout * 4 + n_pad * fout * out_bytes))

    # VMEM budget for the full-row path: double-buffered A stripe + resident
    # Z / W / b (counted x2 conservatively) + double-buffered output stripe.
    fullrow_bytes = (2 * tm * n_pad * 2 + 2 * n_pad * fin * 2
                     + 2 * fin * fout * 2 + 2 * fout * 4
                     + 2 * tm * fout * out_bytes)
    use_fullrow = fullrow_bytes <= _VMEM_BUDGET_BYTES
    if force_path is not None:
        use_fullrow = (force_path == "fullrow")

    if use_fullrow:
        kernel = functools.partial(gcn_fullrow_kernel, relu=relu)
        return pl.pallas_call(
            kernel,
            out_shape=jax.ShapeDtypeStruct((n_pad, fout), out_dtype),
            grid_spec=pltpu.PrefetchScalarGridSpec(
                num_scalar_prefetch=0,
                grid=(n_pad // tm,),
                in_specs=[
                    pl.BlockSpec((tm, n_pad), lambda i: (i, 0)),    # A row stripe
                    pl.BlockSpec((n_pad, fin), lambda i: (0, 0)),   # Z resident
                    pl.BlockSpec((fin, fout), lambda i: (0, 0)),    # W resident
                    pl.BlockSpec((1, fout), lambda i: (0, 0)),      # b resident
                ],
                out_specs=pl.BlockSpec((tm, fout), lambda i: (i, 0)),
            ),
            compiler_params=pltpu.CompilerParams(
                dimension_semantics=("parallel",),
                vmem_limit_bytes=_VMEM_LIMIT_BYTES),
            cost_estimate=cost,
        )(a_p, z_p, w_p, b_p)

    # Tiled-k fallback (row stripe too large for VMEM): reduction axis LAST.
    if tk is None:
        tk = 512 if n_pad % 512 == 0 else 256
    kernel = functools.partial(gcn_tiledk_kernel, relu=relu)
    return pl.pallas_call(
        kernel,
        out_shape=jax.ShapeDtypeStruct((n_pad, fout), out_dtype),
        grid_spec=pltpu.PrefetchScalarGridSpec(
            num_scalar_prefetch=0,
            grid=(n_pad // tm, n_pad // tk),
            in_specs=[
                pl.BlockSpec((tm, tk), lambda i, k: (i, k)),       # A[i, k]
                pl.BlockSpec((n_pad, fin), lambda i, k: (0, 0)),   # Z resident
                pl.BlockSpec((fin, fout), lambda i, k: (0, 0)),    # W resident
                pl.BlockSpec((1, fout), lambda i, k: (0, 0)),      # b resident
            ],
            out_specs=pl.BlockSpec((tm, fout), lambda i, k: (i, 0)),
            scratch_shapes=[pltpu.VMEM((tm, fin), jnp.float32)],
        ),
        compiler_params=pltpu.CompilerParams(
            dimension_semantics=("parallel", "arbitrary"),
            vmem_limit_bytes=_VMEM_LIMIT_BYTES),
        cost_estimate=cost,
    )(a_p, z_p, w_p, b_p)


def rede_neural_fourier_pallas(x, dct_mat, a_norm, w1, b1, w2, b2,
                               *, tm=256, tk=None, force_path=None):
    n, f = x.shape
    hidden = w1.shape[1]
    num_classes = w2.shape[1]

    # Fold DCT + concat into the first-layer weight (exact algebraic identity):
    #   concat([x, x @ C^T], 1) @ W1 == x @ (W1[:F] + C^T @ W1[F:])
    w1_eff = w1[:f] + _mm(dct_mat.T, w1[f:])

    # Lane/tile-friendly padded shapes; zero padding is semantically inert
    # (padded A rows/cols are zero, padded weight rows/cols are zero).
    # n_pad >= 2*tm keeps >= 2 "parallel" stripes so both v7x cores engage.
    n_pad = max(_round_up(n, tm), 2 * tm)
    f_pad = _round_up(f, 128)
    h_pad = _round_up(hidden, 128)
    c_pad = _round_up(num_classes, 128)

    x_p = jnp.zeros((n_pad, f_pad), jnp.bfloat16).at[:n, :f].set(
        x.astype(jnp.bfloat16))
    a_p = jnp.zeros((n_pad, n_pad), jnp.bfloat16).at[:n, :n].set(
        a_norm.astype(jnp.bfloat16))
    w1_p = jnp.zeros((f_pad, h_pad), jnp.bfloat16).at[:f, :hidden].set(
        w1_eff.astype(jnp.bfloat16))
    b1_p = jnp.zeros((1, h_pad), jnp.float32).at[:, :hidden].set(
        jnp.reshape(b1, (1, hidden)))
    w2_p = jnp.zeros((h_pad, c_pad), jnp.bfloat16).at[:hidden, :num_classes].set(
        w2.astype(jnp.bfloat16))
    b2_p = jnp.zeros((1, c_pad), jnp.float32).at[:, :num_classes].set(
        jnp.reshape(b2, (1, num_classes)))

    # Layer 1: h = relu((A @ X) @ W1_eff + b1)  == relu(A @ (X_cat @ W1) + b1)
    h = _gcn_layer(a_p, x_p, w1_p, b1_p, relu=True, out_dtype=jnp.bfloat16,
                   tm=tm, tk=tk, force_path=force_path)
    # Layer 2: out = (A @ H) @ W2 + b2.  H from all nodes feeds the second
    # aggregation, so the two layers need two grid passes.
    out = _gcn_layer(a_p, h, w2_p, b2_p, relu=False, out_dtype=jnp.float32,
                     tm=tm, tk=tk, force_path=force_path)
    return out[:n, :num_classes]


# --------------------------------- JAX glue -----------------------------------
def dct2_ortho_matrix(n):
    """C such that (x @ C.T) == scipy.fftpack.dct(x, type=2, norm='ortho', axis=-1)."""
    k = jnp.arange(n, dtype=jnp.float32)[:, None]
    m = jnp.arange(n, dtype=jnp.float32)[None, :]
    c = jnp.cos(jnp.pi * k * (2.0 * m + 1.0) / (2.0 * n))
    scale = jnp.where(k == 0, 1.0 / math.sqrt(n), math.sqrt(2.0 / n))
    return (scale * c).astype(jnp.float32)


def build_gcn_norm_adj(edge_index, edge_weight, num_nodes):
    """Dense D^{-1/2}(A+I)D^{-1/2}, matching PyG gcn_norm (add_self_loops=True)."""
    src = edge_index[0]
    dst = edge_index[1]
    loop = jnp.arange(num_nodes, dtype=edge_index.dtype)
    src = jnp.concatenate([src, loop])
    dst = jnp.concatenate([dst, loop])
    w = jnp.concatenate(
        [edge_weight.astype(jnp.float32),
         jnp.ones((num_nodes,), dtype=jnp.float32)])
    deg = jnp.zeros((num_nodes,), jnp.float32).at[dst].add(w)
    dinv = jnp.where(deg > 0, 1.0 / jnp.sqrt(deg), 0.0)
    norm = dinv[src] * w * dinv[dst]
    adj = jnp.zeros((num_nodes, num_nodes), jnp.float32).at[dst, src].add(norm)
    return adj


def reference_forward_f32(x, dct_mat, a_norm, w1, b1, w2, b2):
    """Faithful f32 forward of the PyTorch module (eval mode)."""
    x_fft = _mm(x, dct_mat.T)
    x_cat = jnp.concatenate([x, x_fft], axis=1)
    h = jnp.maximum(_mm(a_norm, _mm(x_cat, w1)) + jnp.reshape(b1, (1, -1)), 0.0)
    return _mm(a_norm, _mm(h, w2)) + jnp.reshape(b2, (1, -1))


def reference_forward_bf16io(x, dct_mat, a_norm, w1, b1, w2, b2):
    """Mirrors the kernel's bf16 quantization points (A, X, H, W, agg)."""
    f = x.shape[1]

    def q(v):
        return v.astype(jnp.bfloat16).astype(jnp.float32)

    w1_eff = w1[:f] + _mm(dct_mat.T, w1[f:])
    a_q = q(a_norm)
    agg1 = _mm(a_q, q(x))
    h = jnp.maximum(_mm(q(agg1), q(w1_eff)) + jnp.reshape(b1, (1, -1)), 0.0)
    agg2 = _mm(a_q, q(h))
    return _mm(q(agg2), q(w2)) + jnp.reshape(b2, (1, -1))


# ----------------------------------- main --------------------------------------
if __name__ == "__main__":
    key = jax.random.PRNGKey(0)

    num_nodes = 200       # N  (padded to 512 -> 2 parallel stripes of 256)
    num_features = 12     # F  (DCT applied over this axis)
    hidden_dim = 32       # H
    num_classes = 5       # C
    num_edges = 600       # E

    k_x, k_src, k_dst, k_w, k_w1, k_w2 = jax.random.split(key, 6)

    x = jax.random.normal(k_x, (num_nodes, num_features), dtype=jnp.float32)

    edge_src = jax.random.randint(k_src, (num_edges,), 0, num_nodes)
    edge_dst = jax.random.randint(k_dst, (num_edges,), 0, num_nodes)
    edge_index = jnp.stack([edge_src, edge_dst], axis=0)            # [2, E]
    edge_weight = jax.random.uniform(k_w, (num_edges,), jnp.float32) + 0.5

    fan_in1 = 2 * num_features
    w1 = jax.random.normal(k_w1, (fan_in1, hidden_dim), jnp.float32) \
        * math.sqrt(2.0 / (fan_in1 + hidden_dim))
    b1 = jnp.zeros((1, hidden_dim), jnp.float32)
    w2 = jax.random.normal(k_w2, (hidden_dim, num_classes), jnp.float32) \
        * math.sqrt(2.0 / (hidden_dim + num_classes))
    b2 = jnp.zeros((1, num_classes), jnp.float32)

    dct_mat = dct2_ortho_matrix(num_features)                        # [F, F]
    a_norm = build_gcn_norm_adj(edge_index, edge_weight, num_nodes)  # [N, N]

    # Default (full-row, no reduction axis) path.
    out = jax.block_until_ready(
        rede_neural_fourier_pallas(x, dct_mat, a_norm, w1, b1, w2, b2))
    assert out.shape == (num_nodes, num_classes)

    # Exercise the large-graph tiled-k fallback path too and cross-check.
    out_tk = jax.block_until_ready(
        rede_neural_fourier_pallas(x, dct_mat, a_norm, w1, b1, w2, b2,
                                   force_path="tiledk", tk=256))
    assert jnp.allclose(out, out_tk, atol=1e-2, rtol=1e-2), \
        f"path mismatch: {jnp.max(jnp.abs(out - out_tk))}"

    # Tight structural check vs. a reference with the same bf16 quantization.
    ref_q = reference_forward_bf16io(x, dct_mat, a_norm, w1, b1, w2, b2)
    assert jnp.allclose(out, ref_q, atol=2e-2, rtol=2e-2), \
        f"bf16-aware mismatch: {jnp.max(jnp.abs(out - ref_q))}"

    # Looser fidelity check vs. the pure-f32 module semantics (bf16 data path).
    ref = reference_forward_f32(x, dct_mat, a_norm, w1, b1, w2, b2)
    assert jnp.allclose(out, ref, atol=1.5e-1, rtol=1.5e-1), \
        f"f32 reference mismatch: {jnp.max(jnp.abs(out - ref))}"

    print("KERNEL_OK")
</pallas_src>

<mosaic_0001>
module attributes {stable_mosaic.version = 11 : i64} {
  func.func @gcn_fullrow_kernel(%arg0: i32, %arg1: memref<256x512xbf16, #tpu.memory_space<vmem>>, %arg2: memref<512x128xbf16, #tpu.memory_space<vmem>>, %arg3: memref<128x128xbf16, #tpu.memory_space<vmem>>, %arg4: memref<1x128xf32, #tpu.memory_space<vmem>>, %arg5: memref<256x128xbf16, #tpu.memory_space<vmem>>) attributes {dimension_semantics = [#tpu.dimension_semantics<parallel>], iteration_bounds = array<i64: 2>, scalar_prefetch = 0 : i64, scratch_operands = 0 : i64, tpu.core_type = #tpu.core_type<tc>, window_params = [{transform_indices = @transform_0, window_bounds = array<i64: 256, 512>}, {pipeline_mode = #tpu.pipeline_mode<synchronous>, transform_indices = @transform_1, window_bounds = array<i64: 512, 128>}, {pipeline_mode = #tpu.pipeline_mode<synchronous>, transform_indices = @transform_2, window_bounds = array<i64: 128, 128>}, {pipeline_mode = #tpu.pipeline_mode<synchronous>, transform_indices = @transform_3, window_bounds = array<i64: 1, 128>}, {transform_indices = @transform_4, window_bounds = array<i64: 256, 128>}]} {
    %c0 = arith.constant 0 : index
    %c0_0 = arith.constant 0 : index
    %0 = vector.load %arg1[%c0, %c0_0] : memref<256x512xbf16, #tpu.memory_space<vmem>>, vector<256x512xbf16>
    %c0_1 = arith.constant 0 : index
    %c0_2 = arith.constant 0 : index
    %1 = vector.load %arg2[%c0_1, %c0_2] : memref<512x128xbf16, #tpu.memory_space<vmem>>, vector<512x128xbf16>
    %cst = arith.constant dense<0.000000e+00> : vector<256x128xf32>
    %2 = tpu.matmul %0, %1, %cst {dimension_numbers = #tpu.dot_dimension_numbers<[1], [0], [0], [1], [0, 0, 1, 1], [], []>} : vector<256x512xbf16>, vector<512x128xbf16>, vector<256x128xf32> -> vector<256x128xf32>
    %3 = arith.truncf %2 : vector<256x128xf32> to vector<256x128xbf16>
    %c0_3 = arith.constant 0 : index
    %c0_4 = arith.constant 0 : index
    %4 = vector.load %arg3[%c0_3, %c0_4] : memref<128x128xbf16, #tpu.memory_space<vmem>>, vector<128x128xbf16>
    %cst_5 = arith.constant dense<0.000000e+00> : vector<256x128xf32>
    %5 = tpu.matmul %3, %4, %cst_5 {dimension_numbers = #tpu.dot_dimension_numbers<[1], [0], [0], [1], [0, 0, 1, 1], [], []>} : vector<256x128xbf16>, vector<128x128xbf16>, vector<256x128xf32> -> vector<256x128xf32>
    %c0_6 = arith.constant 0 : index
    %c0_7 = arith.constant 0 : index
    %6 = vector.load %arg4[%c0_6, %c0_7] : memref<1x128xf32, #tpu.memory_space<vmem>>, vector<1x128xf32>
    %7 = vector.broadcast %6 : vector<1x128xf32> to vector<256x128xf32>
    %8 = arith.addf %5, %7 : vector<256x128xf32>
    %cst_8 = arith.constant 0.000000e+00 : f32
    %9 = vector.broadcast %cst_8 : f32 to vector<256x128xf32>
    %10 = arith.maximumf %8, %9 : vector<256x128xf32>
    %11 = arith.truncf %10 : vector<256x128xf32> to vector<256x128xbf16>
    %c0_9 = arith.constant 0 : index
    %c0_10 = arith.constant 0 : index
    %12 = vector.load %arg5[%c0_9, %c0_10] : memref<256x128xbf16, #tpu.memory_space<vmem>>, vector<256x128xbf16>
    tpu.vector_store %arg5[%c0_9, %c0_10], %11 {strides = array<i32>} : memref<256x128xbf16, #tpu.memory_space<vmem>>, vector<256x128xbf16>,
    return
  }
  func.func @transform_0(%arg0: i32) -> (i32, i32) {
    %c0_i32 = arith.constant 0 : i32
    %c0_i32_0 = arith.constant 0 : i32
    return %arg0, %c0_i32 : i32, i32
  }
  func.func @transform_1(%arg0: i32) -> (i32, i32) {
    %c0_i32 = arith.constant 0 : i32
    %c0_i32_0 = arith.constant 0 : i32
    %c0_i32_1 = arith.constant 0 : i32
    return %c0_i32, %c0_i32_0 : i32, i32
  }
  func.func @transform_2(%arg0: i32) -> (i32, i32) {
    %c0_i32 = arith.constant 0 : i32
    %c0_i32_0 = arith.constant 0 : i32
    %c0_i32_1 = arith.constant 0 : i32
    return %c0_i32, %c0_i32_0 : i32, i32
  }
  func.func @transform_3(%arg0: i32) -> (i32, i32) {
    %c0_i32 = arith.constant 0 : i32
    %c0_i32_0 = arith.constant 0 : i32
    %c0_i32_1 = arith.constant 0 : i32
    return %c0_i32, %c0_i32_0 : i32, i32
  }
  func.func @transform_4(%arg0: i32) -> (i32, i32) {
    %c0_i32 = arith.constant 0 : i32
    %c0_i32_0 = arith.constant 0 : i32
    return %arg0, %c0_i32 : i32, i32
  }
}

</mosaic_0001>

<bundles_post_ra>
// kernel: tpu_custom_call.1
= control target key start
LH: loop header
LB: loop body
LE: loop exit
PB: predicated region body
PF: predicated region fallthrough
CT: control target
= control target key end

     0   :  { %9 = vsyncpa [#allocation3], 0  ;;  %s3138_s0 = inlined_call_operand.hbm [shape: bf16[512,512], index: 0, kind: input, shape index: {}]   ;;  %s3139_s1 = inlined_call_operand.hbm [shape: bf16[512,128], index: 1, kind: input, shape index: {}]   ;;  %s3140_s2 = inlined_call_operand.hbm [shape: bf16[128,128], index: 2, kind: input, shape index: {}]   ;;  %s3141_s3 = inlined_call_operand.vmem [shape: f32[1,128], index: 3, kind: input, shape index: {}]   ;;  %s3142_s4 = inlined_call_operand.hbm [shape: bf16[512,128], index: 4, kind: output, shape index: {}]  }
   0x1   :  { %11 = vsyncpa [#allocation3 + $0x1], 0 }
   0x2   :  { %12 = vsyncpa [#allocation6], 0 }
   0x3   :  { %13 = vsyncpa [#allocation4], 0 }
   0x4   :  { %15 = vsyncpa [#allocation4 + $0x1], 0  ;;  %s2757_s15 = smov 0   ;;  %s2759_s16 = smov 0  }
   0x5   :  { %s2761_s17 = smov 0   ;;  %s2763_s18 = smov 0  }
   0x6 LB: > { %s2778_s19 = sadd.s32 4294967295, %s2720_s18   ;;  %s1757_s20 = sadd.s32 4294967294, %s2720_s18   ;;  %s2720_s18 = sphi %s2763_s18, %s3162_s18   ;;  %s2716_s17 = sphi %s2761_s17, %s3161_s17   ;;  %s2712_s16 = sphi %s2759_s16, %s3160_s16   ;;  %s2708_s15 = sphi %s2757_s15, %s3159_s15  }
   0x7   : > { %p41_p0 = scmp.ne.s32.totalorder %s2712_s16, %s2708_s15  ;;  %p3143_p1 = scmp.eq.s32.totalorder %s2778_s19, 0 }
   0x8   : > { %p134_p3 = scmp.eq.s32.totalorder %s1757_s20, 1  ;;  %p1758_p5 = scmp.ge.s32.totalorder %s2720_s18, 1 }
   0x9   : > { %p2787_p4 = por %p3143_p1, %p41_p0  ;;  %p141_p7 = scmp.lt.s32.totalorder %s2720_s18, 3 }
   0xa   : > { %p2792_p6 = por %p134_p3, %p41_p0  ;;  %s2722_s24 = smov [#allocation5]  }
   0xb   : > { %s3146_s21 = scalar_select %p2787_p4, 1, 0 }
   0xc   : > { %s3147_s22 = scalar_select %p2792_p6, 1, 0 }
   0xd   : > { %p2797_p8 = pnand %p1758_p5, %p141_p7  ;;  %s153_s25 = sshll.u32 %s2722_s24, 4  ;;  %s2801_s25 = int_to_ptr.vmem [resolvable:$true] %s153_s25 }
   0xe   : > { %s2723_s27 = smov [#allocation7]   ;;  %s2564_s5 = scalar_lea.hbm %s3139_s1, 4096 }
   0xf   : > { %p2367_p9 = pneg %p2797_p8  ;;  %s166_s28 = sshll.u32 %s2723_s27, 4  ;;  %s2812_s28 = int_to_ptr.vmem [resolvable:$true] %s166_s28 }
  0x10   : > { %p2565_p12 = scmp.ne.s32.totalorder %s3139_s1, %s2564_s5  ;;  %p2571_p5 = scmp.lt.u32.totalorder %s2564_s5, %s3139_s1 }
  0x11   : > { %p2808_p11 = pnand %p2367_p9, %p3143_p1 }
  0x13   : > { %p2566_p13 = pneg %p2808_p11 }
  0x15   : > { %p2567_p0 = pnand %p2566_p13, %p2565_p12 }
  0x17   : > { %p2568_p3 = pneg %p2567_p0 }
  0x19   : > { %p2573_p7 = pnand %p2571_p5, %p2568_p3 }
  0x1b   : > { %2576 = shalt.err (!%p2573_p7)
}
  0x1c   : > { %s2577_s10 = scalar_lea.vmem %s2801_s25, 4096  ;;  %p2585_p2 = scmp.lt.s32.totalorder %s2801_s25, %s2801_s25 }
  0x1d   : > { %p2578_p9 = scmp.ne.s32.totalorder %s2801_s25, %s2577_s10  ;;  %p2586_p12 = scmp.lt.s32.totalorder %s2577_s10, %s2577_s10 }
  0x1f   : > { %p2580_p10 = pnand %p2578_p9, %p2566_p13  ;;  %p2587_p0 = por %p2586_p12, %p2585_p2 }
  0x21   : > { %p2581_p1 = pneg %p2580_p10 }
  0x23   : > { %p2588_p6 = pnand %p2587_p0, %p2581_p1 }
  0x25   : > { %2591 = shalt.err (!%p2588_p6)
}
  0x26   : > { %s2724_s11 = smov 64   ;;  %s2725_s12 = smov 4  }
  0x27   : > { %2370 = dma.hbm_to_vmem [thread:$0]  (!%p2808_p11), %s3139_s1, 4096, %s2801_s25, [#allocation6], %s2724_s11, %s2724_s11, %s2725_s12  }
  0x28   : > { %s2592_s27 = scalar_lea.hbm %s3140_s2, 1024 }
  0x29   : > { %p2593_p2 = scmp.ne.s32.totalorder %s3140_s2, %s2592_s27  ;;  %p2599_p10 = scmp.lt.u32.totalorder %s2592_s27, %s3140_s2 }
  0x2b   : > { %p2595_p1 = pnand %p2593_p2, %p2566_p13 }
  0x2d   : > { %p2596_p6 = pneg %p2595_p1 }
  0x2f   : > { %p2601_p3 = pnand %p2599_p10, %p2596_p6 }
  0x31   : > { %2604 = shalt.err (!%p2601_p3)
}
  0x32   : > { %s2605_s25 = scalar_lea.vmem %s2812_s28, 1024  ;;  %p2613_p12 = scmp.lt.s32.totalorder %s2812_s28, %s2812_s28 }
  0x33   : > { %p2606_p5 = scmp.ne.s32.totalorder %s2812_s28, %s2605_s25  ;;  %p2614_p0 = scmp.lt.s32.totalorder %s2605_s25, %s2605_s25 }
  0x35   : > { %p2608_p7 = pnand %p2606_p5, %p2566_p13  ;;  %p2615_p2 = por %p2614_p0, %p2613_p12 }
  0x37   : > { %p2609_p9 = pneg %p2608_p7 }
  0x39   : > { %p2616_p1 = pnand %p2615_p2, %p2609_p9 }
  0x3b   : > { %2619 = shalt.err (!%p2616_p1)
}
  0x3c   : > { %2373 = dma.hbm_to_vmem [thread:$0]  (!%p2808_p11), %s3140_s2, 1024, %s2812_s28, [#allocation6], %s2724_s11, %s2724_s11, %s2725_s12  }
  0x3d   : > { %s2867_s9 = sadd.s32 1, %s2720_s18   ;;  %s28_s26 = sadd.s32 1, %s2716_s17 }
  0x3e   : > { %s25_s10 = ssub.s32 %s2720_s18, %s2867_s9  ;;  %p35_p13 = scmp.ne.s32.totalorder %s2716_s17, %s2712_s16 }
  0x3f   : > { %p26_p6 = scmp.eq.s32.totalorder %s25_s10, 0  ;;  %p36_p10 = scmp.eq.s32.totalorder %s2720_s18, 0 }
  0x40   : > { %p3150_p3 = scmp.eq.s32.totalorder %s2778_s19, 1  ;;  %p2384_p7 = scmp.lt.s32.totalorder %s2720_s18, 2 }
  0x41   : > { %s2883_s14 = scalar_select %p26_p6, %s2716_s17, %s28_s26  }
  0x42   : > { %p2877_p5 = por %p3150_p3, %p35_p13  ;;  %p37_p9 = por %p36_p10, %p35_p13 }
  0x43   : > { %s183_s20 = sand.u32 1, %s2716_s17   ;;  %s1914_s28 = sshll.u32 %s2720_s18, 13 }
  0x44   : > { %s3151_s13 = scalar_select %p2877_p5, 1, 0 }
  0x45   : > { %s1762_s24 = sshll.u32 %s183_s20, 9  ;;  %s2890_s27 = scalar_lea.hbm %s3138_s0, %s1914_s28 }
  0x46   : > { %s187_s29 = scalar_lea.vmem [#allocation2], %s1762_s24  ;;  %p2894_p11 = pnand %p2384_p7, %p37_p9 }
  0x47   : > { %s195_s30 = sshll.u32 %s187_s29, 4  ;;  %s2898_s6 = scalar_lea.sflag [#allocation3], %s183_s20  ;;  %s2892_s30 = int_to_ptr.vmem [resolvable:$true] %s195_s30 }
  0x48   : > { %s2620_s25 = scalar_lea.hbm %s2890_s27, 8192  ;;  %p2622_p0 = pneg %p2894_p11 }
  0x49   : > { %p2621_p12 = scmp.ne.s32.totalorder %s2890_s27, %s2620_s25  ;;  %s2625_s26 = scalar_lea.hbm %s3138_s0, 16384 }
  0x4a   : > { %p2626_p13 = scmp.lt.u32.totalorder %s2890_s27, %s3138_s0  ;;  %p2627_p6 = scmp.lt.u32.totalorder %s2625_s26, %s2620_s25 }
  0x4b   : > { %p2623_p2 = pnand %p2622_p0, %p2621_p12  ;;  %p2629_p3 = scmp.lt.u32.totalorder %s2620_s25, %s2890_s27 }
  0x4c   : > { %p2628_p10 = por %p2627_p6, %p2626_p13 }
  0x4d   : > { %p2624_p1 = pneg %p2623_p2 }
  0x4e   : > { %p2630_p7 = por %p2629_p3, %p2628_p10 }
  0x50   : > { %p2631_p9 = pnand %p2630_p7, %p2624_p1 }
  0x52   : > { %2634 = shalt.err (!%p2631_p9)
}
  0x53   : > { %s2635_s20 = scalar_lea.vmem %s2892_s30, 8192  ;;  %s2726_s28 = smov [#allocation2]  }
  0x54   : > { %p2636_p12 = scmp.ne.s32.totalorder %s2892_s30, %s2635_s20  ;;  %s2640_s11 = sshll.u32 %s2726_s28, 4  ;;  %s2641_s11 = int_to_ptr.vmem [resolvable:$false] %s2640_s11 }
  0x55   : > { %s2642_s12 = scalar_lea.vmem %s2641_s11, 16384  ;;  %p2643_p4 = scmp.lt.s32.totalorder %s2892_s30, %s2641_s11 }
  0x56   : > { %p2638_p2 = pnand %p2636_p12, %p2622_p0  ;;  %p2644_p13 = scmp.lt.s32.totalorder %s2642_s12, %s2635_s20 }
  0x58   : > { %p2639_p5 = pneg %p2638_p2  ;;  %p2645_p6 = por %p2644_p13, %p2643_p4 }
  0x5a   : > { %p2646_p10 = pnand %p2645_p6, %p2639_p5 }
  0x5c   : > { %2649 = shalt.err (!%p2646_p10)
}
  0x5d   : > { %s2727_s29 = smov 256   ;;  %s2728_s25 = smov 16  }
  0x5e   : > { %2377 = dma.hbm_to_vmem [thread:$0]  (!%p2894_p11), %s2890_s27, 8192, %s2892_s30, %s2898_s6, %s2727_s29, %s2727_s29, %s2728_s25  }
  0x5f   : > { %207 = sbr.rel (%p2797_p8) target bundleno = 748 (0x2ec), region = 36  ;;  %s2929_s7 = sand.u32 (!%p2797_p8), 1, %s2712_s16  }
  0x60   : > { %s1767_s8 = sshll.u32 (!%p2797_p8), %s2929_s7, 9  ;;  %s210_s26 = scalar_lea.sflag (!%p2797_p8), [#allocation3], %s2929_s7 }
  0x61   : > { %s2933_s10 = scalar_lea.vmem (!%p2797_p8), [#allocation2], %s1767_s8  ;;  %p3153_p4 = scmp.ne.s32.totalorder (!%p2797_p8), %s3146_s21, 0 }
  0x66   : > { %2695 = dma.done.wait (%p3153_p4), %s210_s26, 8192  }
  0x67   : > { %2697 = vsyncadd (%p3153_p4), %s210_s26, 4294959104  ;;  %p3154_p5 = scmp.eq.s32.totalorder %s2778_s19, 0 }
  0x69   : > { %2699 = dma.done.wait (%p3154_p5), [#allocation6], 5120   ;;  %p3155_p8 = pmov %p3154_p5 }
  0x6a   : > { %v2428_v0 = vld [vmem:[#allocation5 + $0x40] sm:$0xff]   ;;  %v2430_v2 = vld [vmem:[#allocation5 + $0x48] sm:$0xff]   ;;  %v2432_v4 = vld [vmem:[#allocation5 + $0x50] sm:$0xff]   ;;  %s1770_s27 = sshll.u32 %s2929_s7, 7  ;;  %s1947_s5 = sshll.u32 %s2778_s19, 11 }
  0x6b   : > { %2701 = vsyncadd (%p3155_p8), [#allocation6], 4294962176  ;;  %v2429_v1 = vld [vmem:[#allocation5] sm:$0xff]   ;;  %2339 = vmatprep.subr.bf16.mxu1 %v2428_v0  ;;  %2043 = vmatprep.subr.bf16.mxu0 %v2428_v0  ;;  %v2431_v3 = vld [vmem:[#allocation5 + $0x8] sm:$0xff]   ;;  %s3041_s30 = scalar_lea.vmem [#allocation8], %s1770_s27  ;;  %s3090_s28 = scalar_lea.hbm %s3142_s4, %s1947_s5 }
  0x6c   : > { %2347 = vmatpush3.bf16.msra.mxu1 %v2429_v1  ;;  %2044 = vmatpush3.bf16.msra.mxu0 %v2429_v1  ;;  %v2433_v5 = vld [vmem:[#allocation5 + $0x10] sm:$0xff]   ;;  %v2434_v6 = vld [vmem:[#allocation5 + $0x58] sm:$0xff]   ;;  %v2436_v8 = vld [vmem:[#allocation5 + $0x60] sm:$0xff]   ;;  %s1665_s6 = sshll.u32 %s3041_s30, 4  ;;  %s1652_s19 = scalar_lea.sflag [#allocation4], %s2929_s7  ;;  %s3092_s6 = int_to_ptr.vmem [resolvable:$true] %s1665_s6 }
  0x6d   : > { %2340 = vmatprep.subr.bf16.mxu1 %v2430_v2  ;;  %2045 = vmatprep.subr.bf16.mxu0 %v2430_v2  ;;  %v2435_v7 = vld [vmem:[#allocation5 + $0x18] sm:$0xff]   ;;  %v2437_v9 = vld [vmem:[#allocation5 + $0x20] sm:$0xff]   ;;  %v2438_v10 = vld [vmem:[#allocation5 + $0x68] sm:$0xff]   ;;  %s2650_s11 = scalar_lea.vmem %s3092_s6, 2048  ;;  %p3156_p0 = scmp.ne.s32.totalorder %s3151_s13, 0 }
  0x6e   : > { %v2446_v11 = vld [vmem:[%s2933_s10 + $0x184] ss:$16 sps:$4 sm:$0xff]   ;;  %v2439_v12 = vld [vmem:[#allocation5 + $0x28] sm:$0xff]   ;;  %v2442_v15 = vld [vmem:[#allocation5 + $0x78] sm:$0xff]   ;;  %p2651_p11 = scmp.ne.s32.totalorder %s3092_s6, %s2650_s11  ;;  %s2729_s12 = smov [#allocation8]  }
  0x6f   : > { %1017 = vmatprep.mubr.bf16.mxu1 %v2446_v11  ;;  %v2440_v13 = vld [vmem:[#allocation5 + $0x70] sm:$0xff]   ;;  %v2443_v16 = vld [vmem:[#allocation5 + $0x38] sm:$0xff]   ;;  %v2447_v17 = vld [vmem:[#allocation5 + $0xc0] sm:$0xff]   ;;  %s2654_s29 = sshll.u32 %s2729_s12, 4  ;;  %s2655_s29 = int_to_ptr.vmem [resolvable:$false] %s2654_s29 }
  0x70   : > { %2348 = vmatpush3.bf16.msra.mxu1 %v2431_v3  ;;  %2046 = vmatpush3.bf16.msra.mxu0 %v2431_v3  ;;  %v2441_v14 = vld [vmem:[#allocation5 + $0x30] sm:$0xff]   ;;  %v2448_v19 = vld [vmem:[#allocation5 + $0x80] sm:$0xff]   ;;  %v2449_v21 = vld [vmem:[#allocation5 + $0xc8] sm:$0xff]   ;;  %p2652_p1 = pnand %p2651_p11, %p3156_p0  ;;  %s2656_s25 = scalar_lea.vmem %s2655_s29, 4096 }
  0x71   : > { %2341 = vmatprep.subr.bf16.mxu1 %v2432_v4  ;;  %2047 = vmatprep.subr.bf16.mxu0 %v2432_v4  ;;  %v2444_v18 = vld [vmem:[%s2933_s10 + $0x180] ss:$16 sps:$4 sm:$0xff]   ;;  %v2451_v20 = vld [vmem:[%s2933_s10 + $0x1a4] ss:$16 sps:$4 sm:$0xff]   ;;  %v2450_v22 = vld [vmem:[#allocation5 + $0x88] sm:$0xff]   ;;  %p2657_p7 = scmp.lt.s32.totalorder %s3092_s6, %s2655_s29  ;;  %p2658_p9 = scmp.lt.s32.totalorder %s2656_s25, %s2650_s11 }
  0x72   : > { %v2453_v23 = vld [vmem:[%s2933_s10 + $0x1a0] ss:$16 sps:$4 sm:$0xff]   ;;  %v2474_v27 = vld [vmem:[%s2933_s10 + $0x4] ss:$16 sps:$4 sm:$0xff]   ;;  %v2456_v28 = vld [vmem:[#allocation5 + $0xd8] sm:$0xff]   ;;  %p2653_p3 = pneg %p2652_p1 }
  0x73   : > { %v2454_v24 = vld [vmem:[#allocation5 + $0xd0] sm:$0xff]   ;;  %921 = vmatprep.mubr.bf16.mxu0 %v2474_v27  ;;  %v2457_v31 = vld [vmem:[#allocation5 + $0x98] sm:$0xff]   ;;  %v2461_v33 = vld [vmem:[#allocation5 + $0xe0] sm:$0xff]   ;;  %p2659_p12 = por %p2658_p9, %p2657_p7 }
  0x74   : > { %2349 = vmatpush3.bf16.msra.mxu1 %v2433_v5  ;;  %2048 = vmatpush3.bf16.msra.mxu0 %v2433_v5  ;;  %v2455_v25 = vld [vmem:[#allocation5 + $0x90] sm:$0xff]   ;;  %v2462_v36 = vld [vmem:[#allocation5 + $0xa0] sm:$0xff]   ;;  %v2463_v38 = vld [vmem:[#allocation5 + $0xe8] sm:$0xff]  }
  0x75   : > { %2342 = vmatprep.subr.bf16.mxu1 %v2434_v6  ;;  %2049 = vmatprep.subr.bf16.mxu0 %v2434_v6  ;;  %v2472_v26 = vld [vmem:[%s2933_s10] ss:$16 sps:$4 sm:$0xff]   ;;  %v2458_v29 = vld [vmem:[%s2933_s10 + $0x1c4] ss:$16 sps:$4 sm:$0xff]   ;;  %v2464_v39 = vld [vmem:[#allocation5 + $0xa8] sm:$0xff]   ;;  %p2660_p2 = pnand %p2659_p12, %p2653_p3 }
  0x76   : > { %v2478_v30 = vld [vmem:[%s2933_s10 + $0x24] ss:$16 sps:$4 sm:$0xff]   ;;  %v2460_v32 = vld [vmem:[%s2933_s10 + $0x1c0] ss:$16 sps:$4 sm:$0xff]   ;;  %v2477_v45 = vld [vmem:[%s2933_s10 + $0xc] ss:$16 sps:$4 sm:$0xff]  }
  0x77   : > { %v2482_v34 = vld [vmem:[%s2933_s10 + $0x20] ss:$16 sps:$4 sm:$0xff]   ;;  %v2484_v35 = vld [vmem:[%s2933_s10 + $0x44] ss:$16 sps:$4 sm:$0xff]   ;;  %v2470_v46 = vld [vmem:[#allocation5 + $0xf8] sm:$0xff]  }
  0x78   : > { %2350 = vmatpush3.bf16.msra.mxu1 %v2435_v7  ;;  %2050 = vmatpush3.bf16.msra.mxu0 %v2435_v7  ;;  %v2465_v37 = vld [vmem:[%s2933_s10 + $0x1e4] ss:$16 sps:$4 sm:$0xff]   ;;  %v2467_v40 = vld [vmem:[%s2933_s10 + $0x1e0] ss:$16 sps:$4 sm:$0xff]   ;;  %v2471_v47 = vld [vmem:[#allocation5 + $0xb8] sm:$0xff]  }
  0x79   : > { %2343 = vmatprep.subr.bf16.mxu1 %v2436_v8  ;;  %2051 = vmatprep.subr.bf16.mxu0 %v2436_v8  ;;  %v2468_v41 = vld [vmem:[#allocation5 + $0xf0] sm:$0xff]   ;;  %v2475_v48 = vld [vmem:[%s2933_s10 + $0x8] ss:$16 sps:$4 sm:$0xff]   ;;  %v2480_v51 = vld [vmem:[%s2933_s10 + $0x2c] ss:$16 sps:$4 sm:$0xff]  }
  0x7a   : > { %v2488_v42 = vld [vmem:[%s2933_s10 + $0x40] ss:$16 sps:$4 sm:$0xff]   ;;  %v2490_v43 = vld [vmem:[%s2933_s10 + $0x64] ss:$16 sps:$4 sm:$0xff]   ;;  %v2483_v53 = vld [vmem:[%s2933_s10 + $0x28] ss:$16 sps:$4 sm:$0xff]  }
  0x7b   : > { %v2469_v44 = vld [vmem:[#allocation5 + $0xb0] sm:$0xff]   ;;  %v2486_v55 = vld [vmem:[%s2933_s10 + $0x4c] ss:$16 sps:$4 sm:$0xff]   ;;  %v2489_v57 = vld [vmem:[%s2933_s10 + $0x48] ss:$16 sps:$4 sm:$0xff]  }
  0x7c   : > { %2351 = vmatpush3.bf16.msra.mxu1 %v2437_v9  ;;  %2052 = vmatpush3.bf16.msra.mxu0 %v2437_v9  ;;  %v2494_v49 = vld [vmem:[%s2933_s10 + $0x60] ss:$16 sps:$4 sm:$0xff]   ;;  %v2496_v50 = vld [vmem:[%s2933_s10 + $0x84] ss:$16 sps:$4 sm:$0xff]   ;;  %v2492_v59 = vld [vmem:[%s2933_s10 + $0x6c] ss:$16 sps:$4 sm:$0xff]  }
  0x7d   : > { %2344 = vmatprep.subr.bf16.mxu1 %v2438_v10  ;;  %2053 = vmatprep.subr.bf16.mxu0 %v2438_v10  ;;  %v2500_v52 = vld [vmem:[%s2933_s10 + $0x80] ss:$16 sps:$4 sm:$0xff]   ;;  %v2502_v54 = vld [vmem:[%s2933_s10 + $0xa4] ss:$16 sps:$4 sm:$0xff]   ;;  %v2495_v61 = vld [vmem:[%s2933_s10 + $0x68] ss:$16 sps:$4 sm:$0xff]  }
  0x7e   : > { %v2506_v56 = vld [vmem:[%s2933_s10 + $0xa0] ss:$16 sps:$4 sm:$0xff]   ;;  %v2508_v58 = vld [vmem:[%s2933_s10 + $0xc4] ss:$16 sps:$4 sm:$0xff]   ;;  %v2498_v63 = vld [vmem:[%s2933_s10 + $0x8c] ss:$16 sps:$4 sm:$0xff]  }
  0x7f   : > { %v2512_v60 = vld [vmem:[%s2933_s10 + $0xc0] ss:$16 sps:$4 sm:$0xff]   ;;  %v2514_v62 = vld [vmem:[%s2933_s10 + $0xe4] ss:$16 sps:$4 sm:$0xff]   ;;  %v2501_v1 = vld [vmem:[%s2933_s10 + $0x88] ss:$16 sps:$4 sm:$0xff]  }
  0x80   : > { %2352 = vmatpush3.bf16.msra.mxu1 %v2439_v12  ;;  %2054 = vmatpush3.bf16.msra.mxu0 %v2439_v12  ;;  %v2518_v0 = vld [vmem:[%s2933_s10 + $0xe0] ss:$16 sps:$4 sm:$0xff]   ;;  %v2520_v2 = vld [vmem:[%s2933_s10 + $0x104] ss:$16 sps:$4 sm:$0xff]   ;;  %v2504_v3 = vld [vmem:[%s2933_s10 + $0xac] ss:$16 sps:$4 sm:$0xff]  }
  0x81   : > { %2345 = vmatprep.subr.bf16.mxu1 %v2440_v13  ;;  %2055 = vmatprep.subr.bf16.mxu0 %v2440_v13  ;;  %v2524_v4 = vld [vmem:[%s2933_s10 + $0x100] ss:$16 sps:$4 sm:$0xff]   ;;  %v2507_v5 = vld [vmem:[%s2933_s10 + $0xa8] ss:$16 sps:$4 sm:$0xff]   ;;  %v2526_v6 = vld [vmem:[%s2933_s10 + $0x124] ss:$16 sps:$4 sm:$0xff]  }
  0x82   : > { %v2510_v7 = vld [vmem:[%s2933_s10 + $0xcc] ss:$16 sps:$4 sm:$0xff]   ;;  %v2530_v8 = vld [vmem:[%s2933_s10 + $0x120] ss:$16 sps:$4 sm:$0xff]   ;;  %v2513_v9 = vld [vmem:[%s2933_s10 + $0xc8] ss:$16 sps:$4 sm:$0xff]  }
  0x83   : > { %v2532_v10 = vld [vmem:[%s2933_s10 + $0x144] ss:$16 sps:$4 sm:$0xff]   ;;  %v2516_v11 = vld [vmem:[%s2933_s10 + $0xec] ss:$16 sps:$4 sm:$0xff]   ;;  %v2536_v12 = vld [vmem:[%s2933_s10 + $0x140] ss:$16 sps:$4 sm:$0xff]  }
  0x84   : > { %2353 = vmatpush3.bf16.msra.mxu1 %v2441_v14  ;;  %2056 = vmatpush3.bf16.msra.mxu0 %v2441_v14  ;;  %v2519_v13 = vld [vmem:[%s2933_s10 + $0xe8] ss:$16 sps:$4 sm:$0xff]   ;;  %v2538_v14 = vld [vmem:[%s2933_s10 + $0x164] ss:$16 sps:$4 sm:$0xff]  }
  0x85   : > { %2346 = vmatprep.subr.bf16.mxu1 %v2442_v15  ;;  %2057 = vmatprep.subr.bf16.mxu0 %v2442_v15  ;;  %v2522_v15 = vld [vmem:[%s2933_s10 + $0x10c] ss:$16 sps:$4 sm:$0xff]   ;;  %v2560_v27 = vld [vmem:[#allocation7 + $0x20] sm:$0xff]  }
  0x88   : > { %2354 = vmatpush3.bf16.msra.mxu1 %v2443_v16  ;;  %2058 = vmatpush3.bf16.msra.mxu0 %v2443_v16  ;;  %v2542_v16 = vld [vmem:[%s2933_s10 + $0x160] ss:$16 sps:$4 sm:$0xff]  }
  0x89   : > { %2155 = vmatprep.subr.bf16.mxu1 %v2447_v17  ;;  %v2525_v17 = vld [vmem:[%s2933_s10 + $0x108] ss:$16 sps:$4 sm:$0xff]  }
  0x8b   : > { %1018 = vmatmul.mubr.bf16.vlgmr.msra.gmra.mrb[0].mxu1 %v2444_v18  ;;  %922 = vmatmul.mubr.bf16.vlgmr.msra.gmra.mrb[0].mxu0 %v2472_v26  ;;  %v2528_v18 = vld [vmem:[%s2933_s10 + $0x12c] ss:$16 sps:$4 sm:$0xff]  }
  0x8c   : > { %2156 = vmatpush3.bf16.msra.mxu1 %v2448_v19  ;;  %1025 = vmatprep.mubr.bf16.mxu1 %v2451_v20  ;;  %v2556_v19 = vld [vmem:[#allocation7] sm:$0xff]   ;;  %v2531_v20 = vld [vmem:[%s2933_s10 + $0x128] ss:$16 sps:$4 sm:$0xff]  }
  0x8d   : > { %2157 = vmatprep.subr.bf16.mxu1 %v2449_v21  ;;  %929 = vmatprep.mubr.bf16.mxu0 %v2478_v30  ;;  %v2534_v21 = vld [vmem:[%s2933_s10 + $0x14c] ss:$16 sps:$4 sm:$0xff]  }
  0x8e   : > { %2291 = vmatprep.subr.bf16.mxu0 %v2556_v19  ;;  %v2559_v26 = vld [vmem:[#allocation7 + $0x18] sm:$0xff]   ;;  %v2561_v30 = vld [vmem:[#allocation7 + $0x28] sm:$0xff]  }
  0x8f   : > { %2292 = vmatpush3.bf16.msra.mxu0 %v2556_v19 }
  0x90   : > { %2158 = vmatpush3.bf16.msra.mxu1 %v2450_v22  ;;  %v2557_v22 = vld [vmem:[#allocation7 + $0x8] sm:$0xff]  }
  0x91   : > { %2159 = vmatprep.subr.bf16.mxu1 %v2454_v24  ;;  %2293 = vmatprep.subr.bf16.mxu0 %v2557_v22  ;;  %v2537_v24 = vld [vmem:[%s2933_s10 + $0x148] ss:$16 sps:$4 sm:$0xff]  }
  0x93   : > { %1026 = vmatmul.mubr.bf16.gmra.mrb[4].mxu1 %v2453_v23  ;;  %930 = vmatmul.mubr.bf16.gmra.mrb[4].mxu0 %v2482_v34  ;;  %v2558_v23 = vld [vmem:[#allocation7 + $0x10] sm:$0xff]   ;;  %v2563_v34 = vld [vmem:[#allocation7 + $0x38] sm:$0xff]  }
  0x94   : > { %2160 = vmatpush3.bf16.msra.mxu1 %v2455_v25  ;;  %1033 = vmatprep.mubr.bf16.mxu1 %v2458_v29  ;;  %v2540_v25 = vld [vmem:[%s2933_s10 + $0x16c] ss:$16 sps:$4 sm:$0xff]  }
  0x95   : > { %2161 = vmatprep.subr.bf16.mxu1 %v2456_v28  ;;  %937 = vmatprep.mubr.bf16.mxu0 %v2484_v35  ;;  %v2543_v28 = vld [vmem:[%s2933_s10 + $0x168] ss:$16 sps:$4 sm:$0xff]   ;;  %v2544_v29 = vld [vmem:[%s2933_s10 + $0x18c] ss:$16 sps:$4 sm:$0xff]  }
  0x96   : > { %2294 = vmatpush3.bf16.msra.mxu0 %v2557_v22  ;;  %v2549_v35 = vld [vmem:[%s2933_s10 + $0x1a8] ss:$16 sps:$4 sm:$0xff]  }
  0x97   : > { %2295 = vmatprep.subr.bf16.mxu0 %v2558_v23 }
  0x98   : > { %2162 = vmatpush3.bf16.msra.mxu1 %v2457_v31  ;;  %v2562_v31 = vld [vmem:[#allocation7 + $0x30] sm:$0xff]  }
  0x99   : > { %2163 = vmatprep.subr.bf16.mxu1 %v2461_v33  ;;  %v2547_v33 = vld [vmem:[%s2933_s10 + $0x1ac] ss:$16 sps:$4 sm:$0xff]  }
  0x9a   : > { %2296 = vmatpush3.bf16.msra.mxu0 %v2558_v23 }
  0x9b   : > { %1034 = vmatmul.mubr.bf16.gmra.mrb[8].mxu1 %v2460_v32  ;;  %938 = vmatmul.mubr.bf16.gmra.mrb[8].mxu0 %v2488_v42  ;;  %v2546_v32 = vld [vmem:[%s2933_s10 + $0x188] ss:$16 sps:$4 sm:$0xff]  }
  0x9c   : > { %2164 = vmatpush3.bf16.msra.mxu1 %v2462_v36  ;;  %1041 = vmatprep.mubr.bf16.mxu1 %v2465_v37  ;;  %v2550_v36 = vld [vmem:[%s2933_s10 + $0x1cc] ss:$16 sps:$4 sm:$0xff]   ;;  %v2552_v37 = vld [vmem:[%s2933_s10 + $0x1c8] ss:$16 sps:$4 sm:$0xff]  }
  0x9d   : > { %2165 = vmatprep.subr.bf16.mxu1 %v2463_v38  ;;  %945 = vmatprep.mubr.bf16.mxu0 %v2490_v43  ;;  %v2553_v38 = vld [vmem:[%s2933_s10 + $0x1ec] ss:$16 sps:$4 sm:$0xff]  }
  0x9e   : > { %2297 = vmatprep.subr.bf16.mxu0 %v2559_v26 }
  0x9f   : > { %2298 = vmatpush3.bf16.msra.mxu0 %v2559_v26 }
  0xa0   : > { %2166 = vmatpush3.bf16.msra.mxu1 %v2464_v39  ;;  %2299 = vmatprep.subr.bf16.mxu0 %v2560_v27  ;;  %v2555_v39 = vld [vmem:[%s2933_s10 + $0x1e8] ss:$16 sps:$4 sm:$0xff]  }
  0xa1   : > { %2167 = vmatprep.subr.bf16.mxu1 %v2468_v41 }
  0xa3   : > { %1042 = vmatmul.mubr.bf16.gmra.mrb[12].mxu1 %v2467_v40  ;;  %946 = vmatmul.mubr.bf16.gmra.mrb[12].mxu0 %v2494_v49 }
  0xa4   : > { %2168 = vmatpush3.bf16.msra.mxu1 %v2469_v44  ;;  %1082 = vmatprep.mubr.bf16.mxu1 %v2477_v45 }
  0xa5   : > { %2169 = vmatprep.subr.bf16.mxu1 %v2470_v46  ;;  %953 = vmatprep.mubr.bf16.mxu0 %v2496_v50 }
  0xa6   : > { %2300 = vmatpush3.bf16.msra.mxu0 %v2560_v27 }
  0xa7   : > { %2301 = vmatprep.subr.bf16.mxu0 %v2561_v30 }
  0xa8   : > { %2170 = vmatpush3.bf16.msra.mxu1 %v2471_v47 }
  0xaa   : > { %2302 = vmatpush3.bf16.msra.mxu0 %v2561_v30 }
  0xab   : > { %1083 = vmatmul.mubr.bf16.vlgmr.msra.gmra.mrb[16].mxu1 %v2475_v48  ;;  %954 = vmatmul.mubr.bf16.gmra.mrb[16].mxu0 %v2500_v52 }
  0xac   : > { %1090 = vmatprep.mubr.bf16.mxu1 %v2480_v51  ;;  %961 = vmatprep.mubr.bf16.mxu0 %v2502_v54 }
  0xad   : > { %2303 = vmatprep.subr.bf16.mxu0 %v2562_v31 }
  0xae   : > { %2304 = vmatpush3.bf16.msra.mxu0 %v2562_v31 }
  0xaf   : > { %2305 = vmatprep.subr.bf16.mxu0 %v2563_v34 }
  0xb2   : > { %2306 = vmatpush3.bf16.msra.mxu0 %v2563_v34 }
  0xb3   : > { %1091 = vmatmul.mubr.bf16.gmra.mrb[20].mxu1 %v2483_v53  ;;  %962 = vmatmul.mubr.bf16.gmra.mrb[20].mxu0 %v2506_v56 }
  0xb4   : > { %1098 = vmatprep.mubr.bf16.mxu1 %v2486_v55  ;;  %969 = vmatprep.mubr.bf16.mxu0 %v2508_v58 }
  0xbb   : > { %1099 = vmatmul.mubr.bf16.gmra.mrb[24].mxu1 %v2489_v57  ;;  %970 = vmatmul.mubr.bf16.gmra.mrb[24].mxu0 %v2512_v60 }
  0xbc   : > { %1106 = vmatprep.mubr.bf16.mxu1 %v2492_v59  ;;  %977 = vmatprep.mubr.bf16.mxu0 %v2514_v62 }
  0xc3   : > { %1107 = vmatmul.mubr.bf16.gmra.mrb[28].mxu1 %v2495_v61  ;;  %978 = vmatmul.mubr.bf16.gmra.mrb[28].mxu0 %v2518_v0 }
  0xc4   : > { %1114 = vmatprep.mubr.bf16.mxu1 %v2498_v63  ;;  %985 = vmatprep.mubr.bf16.mxu0 %v2520_v2 }
  0xcb   : > { %1115 = vmatmul.mubr.bf16.gmra.mrb[32].mxu1 %v2501_v1  ;;  %986 = vmatmul.mubr.bf16.gmra.mrb[32].mxu0 %v2524_v4 }
  0xcc   : > { %1122 = vmatprep.mubr.bf16.mxu1 %v2504_v3  ;;  %993 = vmatprep.mubr.bf16.mxu0 %v2526_v6 }
  0xd3   : > { %1123 = vmatmul.mubr.bf16.gmra.mrb[36].mxu1 %v2507_v5  ;;  %994 = vmatmul.mubr.bf16.gmra.mrb[36].mxu0 %v2530_v8 }
  0xd4   : > { %1130 = vmatprep.mubr.bf16.mxu1 %v2510_v7  ;;  %1001 = vmatprep.mubr.bf16.mxu0 %v2532_v10 }
  0xdb   : > { %1131 = vmatmul.mubr.bf16.gmra.mrb[40].mxu1 %v2513_v9  ;;  %1002 = vmatmul.mubr.bf16.gmra.mrb[40].mxu0 %v2536_v12 }
  0xdc   : > { %1138 = vmatprep.mubr.bf16.mxu1 %v2516_v11  ;;  %1009 = vmatprep.mubr.bf16.mxu0 %v2538_v14 }
  0xe3   : > { %1139 = vmatmul.mubr.bf16.gmra.mrb[44].mxu1 %v2519_v13  ;;  %1010 = vmatmul.mubr.bf16.gmra.mrb[44].mxu0 %v2542_v16 }
  0xe4   : > { %1146 = vmatprep.mubr.bf16.mxu1 %v2522_v15 }
  0xeb   : > { %1147 = vmatmul.mubr.bf16.gmra.mrb[48].mxu1 %v2525_v17 }
  0xec   : > { %1154 = vmatprep.mubr.bf16.mxu1 %v2528_v18 }
  0xf3   : > { %1155 = vmatmul.mubr.bf16.gmra.mrb[52].mxu1 %v2531_v20 }
  0xf4   : > { %1162 = vmatprep.mubr.bf16.mxu1 %v2534_v21 }
  0xfb   : > { %1163 = vmatmul.mubr.bf16.gmra.mrb[56].mxu1 %v2537_v24 }
  0xfc   : > { %1170 = vmatprep.mubr.bf16.mxu1 %v2540_v25 }
 0x103   : > { %1171 = vmatmul.mubr.bf16.gmra.mrb[60].mxu1 %v2543_v28 }
 0x104   : > { %1178 = vmatprep.mubr.bf16.mxu1 %v2544_v29 }
 0x10b   : > { %1179 = vmatmul.mubr.bf16.gmra.mrb[64].mxu1 %v2546_v32 }
 0x10c   : > { %1186 = vmatprep.mubr.bf16.mxu1 %v2547_v33 }
 0x113   : > { %1187 = vmatmul.mubr.bf16.gmra.mrb[68].mxu1 %v2549_v35 }
 0x114   : > { %1194 = vmatprep.mubr.bf16.mxu1 %v2550_v36 }
 0x11b   : > { %1195 = vmatmul.mubr.bf16.gmra.mrb[72].mxu1 %v2552_v37 }
 0x11c   : > { %1202 = vmatprep.mubr.bf16.mxu1 %v2553_v38 }
 0x123   : > { %1203 = vmatmul.mubr.bf16.gmra.mrb[76].mxu1 %v2555_v39 }
 0x15e   : > { %v2131_v40 = vpop.f32.mrb[0].mxu1  ;;  %v2059_v46 = vpop.f32.mrb[0].mxu0 }
 0x15f   : > { %v2132_v41 = vpop.f32.mrb[1].mxu1  ;;  %v2060_v48 = vpop.f32.mrb[1].mxu0 }
 0x160   : > { %v3007_v42 = vadd.f32 %v2132_v41, %v2131_v40  ;;  %v2134_v43 = vpop.f32.mrb[2].mxu1  ;;  %v2061_v50 = vadd.f32 %v2060_v48, %v2059_v46  ;;  %v2062_v51 = vpop.f32.mrb[2].mxu0 }
 0x161   : > { %v2135_v44 = vpop.f32.mrb[3].mxu1  ;;  %v2063_v54 = vpop.f32.mrb[3].mxu0 }
 0x162   : > { %v3009_v45 = vadd.f32 %v2135_v44, %v2134_v43  ;;  %v2064_v56 = vadd.f32 %v2063_v54, %v2062_v51 }
 0x166   : > { %v2137_v47 = vpop.f32.mrb[4].mxu1  ;;  %v2065_v58 = vpop.f32.mrb[4].mxu0 }
 0x167   : > { %v2138_v49 = vpop.f32.mrb[5].mxu1  ;;  %v2066_v60 = vpop.f32.mrb[5].mxu0 }
 0x168   : > { %v3011_v52 = vadd.f32 %v2138_v49, %v2137_v47  ;;  %v2140_v53 = vpop.f32.mrb[6].mxu1  ;;  %v2067_v62 = vadd.f32 %v2066_v60, %v2065_v58  ;;  %v2068_v63 = vpop.f32.mrb[6].mxu0 }
 0x169   : > { %v2141_v55 = vpop.f32.mrb[7].mxu1  ;;  %v2069_v2 = vpop.f32.mrb[7].mxu0 }
 0x16a   : > { %v3013_v57 = vadd.f32 %v2141_v55, %v2140_v53  ;;  %v2070_v4 = vadd.f32 %v2069_v2, %v2068_v63 }
 0x16e   : > { %v2143_v59 = vpop.f32.mrb[8].mxu1  ;;  %v2071_v6 = vpop.f32.mrb[8].mxu0 }
 0x16f   : > { %v2144_v61 = vpop.f32.mrb[9].mxu1  ;;  %v2072_v8 = vpop.f32.mrb[9].mxu0 }
 0x170   : > { %v3015_v0 = vadd.f32 %v2144_v61, %v2143_v59  ;;  %v2146_v1 = vpop.f32.mrb[10].mxu1  ;;  %v2073_v10 = vadd.f32 %v2072_v8, %v2071_v6  ;;  %v2074_v11 = vpop.f32.mrb[10].mxu0 }
 0x171   : > { %v2147_v3 = vpop.f32.mrb[11].mxu1  ;;  %v2075_v14 = vpop.f32.mrb[11].mxu0 }
 0x172   : > { %v3017_v5 = vadd.f32 %v2147_v3, %v2146_v1  ;;  %v2076_v16 = vadd.f32 %v2075_v14, %v2074_v11 }
 0x176   : > { %v2149_v7 = vpop.f32.mrb[12].mxu1  ;;  %v2077_v18 = vpop.f32.mrb[12].mxu0 }
 0x177   : > { %v2150_v9 = vpop.f32.mrb[13].mxu1  ;;  %v2078_v20 = vpop.f32.mrb[13].mxu0 }
 0x178   : > { %v3019_v12 = vadd.f32 %v2150_v9, %v2149_v7  ;;  %v2152_v13 = vpop.f32.mrb[14].mxu1  ;;  %v2079_v22 = vadd.f32 %v2078_v20, %v2077_v18  ;;  %v2080_v23 = vpop.f32.mrb[14].mxu0 }
 0x179   : > { %v2153_v15 = vpop.f32.mrb[15].mxu1  ;;  %v2081_v26 = vpop.f32.mrb[15].mxu0 }
 0x17a   : > { %v3021_v17 = vadd.f32 %v2153_v15, %v2152_v13  ;;  %v2082_v28 = vadd.f32 %v2081_v26, %v2080_v23 }
 0x17e   : > { %v2171_v19 = vpop.f32.mrb[16].mxu1  ;;  %v2083_v32 = vpop.f32.mrb[16].mxu0 }
 0x17f   : > { %v2172_v21 = vpop.f32.mrb[17].mxu1  ;;  %v2084_v35 = vpop.f32.mrb[17].mxu0 }
 0x180   : > { %v2173_v24 = vadd.f32 %v2172_v21, %v2171_v19  ;;  %v2174_v25 = vpop.f32.mrb[18].mxu1  ;;  %v2085_v37 = vadd.f32 %v2084_v35, %v2083_v32  ;;  %v2086_v38 = vpop.f32.mrb[18].mxu0 }
 0x181   : > { %v2175_v27 = vpop.f32.mrb[19].mxu1  ;;  %v2087_v41 = vpop.f32.mrb[19].mxu0 }
 0x182   : > { %v1085_v29 = vadd.f32 %v2173_v24, %v2061_v50  ;;  %v2176_v30 = vadd.f32 %v2175_v27, %v2174_v25  ;;  %v2088_v44 = vadd.f32 %v2087_v41, %v2086_v38 }
 0x184   : > { %v1088_v31 = vadd.f32 %v2176_v30, %v2064_v56 }
 0x186   : > { %v2177_v33 = vpop.f32.mrb[20].mxu1  ;;  %v1211_v34 = vpack.c.bf16 %v1088_v31, %v1085_v29  ;;  %v2089_v49 = vpop.f32.mrb[20].mxu0 }
 0x187   : > { %v2178_v36 = vpop.f32.mrb[21].mxu1  ;;  %v2090_v53 = vpop.f32.mrb[21].mxu0 }
 0x188   : > { %v2179_v39 = vadd.f32 %v2178_v36, %v2177_v33  ;;  %v2180_v40 = vpop.f32.mrb[22].mxu1  ;;  %2307 = vmatprep.mubr.bf16.mxu0 %v1211_v34  ;;  %v2091_v55 = vadd.f32 %v2090_v53, %v2089_v49  ;;  %v2092_v56 = vpop.f32.mrb[22].mxu0 }
 0x189   : > { %v2181_v43 = vpop.f32.mrb[23].mxu1  ;;  %v2093_v60 = vpop.f32.mrb[23].mxu0 }
 0x18a   : > { %v1093_v46 = vadd.f32 %v2179_v39, %v2067_v62  ;;  %v2182_v47 = vadd.f32 %v2181_v43, %v2180_v40  ;;  %v2094_v63 = vadd.f32 %v2093_v60, %v2092_v56 }
 0x18c   : > { %v1096_v48 = vadd.f32 %v2182_v47, %v2070_v4 }
 0x18e   : > { %v1212_v50 = vpack.c.bf16 %v1096_v48, %v1093_v46  ;;  %v2183_v51 = vpop.f32.mrb[24].mxu1  ;;  %v2095_v6 = vpop.f32.mrb[24].mxu0 }
 0x18f   : > { %v2184_v54 = vpop.f32.mrb[25].mxu1  ;;  %v2096_v4 = vpop.f32.mrb[25].mxu0 }
 0x190   : > { %v2185_v58 = vadd.f32 %v2184_v54, %v2183_v51  ;;  %v2186_v59 = vpop.f32.mrb[26].mxu1  ;;  %2308 = vmatmul.mubr.bf16.vlgmr.msra.gmra.mrb[48].mxu0 %v1212_v50  ;;  %v2097_v9 = vadd.f32 %v2096_v4, %v2095_v6  ;;  %v2098_v11 = vpop.f32.mrb[26].mxu0 }
 0x191   : > { %v2187_v61 = vpop.f32.mrb[27].mxu1  ;;  %v2099_v15 = vpop.f32.mrb[27].mxu0 }
 0x192   : > { %v1101_v1 = vadd.f32 %v2185_v58, %v2073_v10  ;;  %v2188_v2 = vadd.f32 %v2187_v61, %v2186_v59  ;;  %v2100_v19 = vadd.f32 %v2099_v15, %v2098_v11 }
 0x194   : > { %v1104_v3 = vadd.f32 %v2188_v2, %v2076_v16 }
 0x196   : > { %v2189_v62 = vpop.f32.mrb[28].mxu1  ;;  %v1213_v7 = vpack.c.bf16 %v1104_v3, %v1101_v1  ;;  %v2101_v24 = vpop.f32.mrb[28].mxu0 }
 0x197   : > { %v2190_v8 = vpop.f32.mrb[29].mxu1  ;;  %v2102_v16 = vpop.f32.mrb[29].mxu0 }
 0x198   : > { %v2191_v13 = vadd.f32 %v2190_v8, %v2189_v62  ;;  %v2192_v14 = vpop.f32.mrb[30].mxu1  ;;  %2311 = vmatprep.mubr.bf16.mxu0 %v1213_v7  ;;  %v2103_v27 = vadd.f32 %v2102_v16, %v2101_v24  ;;  %v2104_v29 = vpop.f32.mrb[30].mxu0 }
 0x199   : > { %v2193_v18 = vpop.f32.mrb[31].mxu1  ;;  %v2105_v32 = vpop.f32.mrb[31].mxu0 }
 0x19a   : > { %v1109_v20 = vadd.f32 %v2191_v13, %v2079_v22  ;;  %v2194_v21 = vadd.f32 %v2193_v18, %v2192_v14  ;;  %v2106_v34 = vadd.f32 %v2105_v32, %v2104_v29 }
 0x19c   : > { %v1112_v23 = vadd.f32 %v2194_v21, %v2082_v28 }
 0x19e   : > { %v2195_v10 = vpop.f32.mrb[32].mxu1  ;;  %v1214_v25 = vpack.c.bf16 %v1112_v23, %v1109_v20  ;;  %v2107_v39 = vpop.f32.mrb[32].mxu0 }
 0x19f   : > { %v2196_v26 = vpop.f32.mrb[33].mxu1  ;;  %v2108_v28 = vpop.f32.mrb[33].mxu0 }
 0x1a0   : > { %v2197_v30 = vadd.f32 %v2196_v26, %v2195_v10  ;;  %v2198_v31 = vpop.f32.mrb[34].mxu1  ;;  %2312 = vmatmul.mubr.bf16.gmra.mrb[52].mxu0 %v1214_v25  ;;  %v2109_v43 = vadd.f32 %v2108_v28, %v2107_v39  ;;  %v2110_v46 = vpop.f32.mrb[34].mxu0 }
 0x1a1   : > { %v2199_v33 = vpop.f32.mrb[35].mxu1  ;;  %v2111_v49 = vpop.f32.mrb[35].mxu0 }
 0x1a2   : > { %v1117_v35 = vadd.f32 %v2197_v30, %v2085_v37  ;;  %v2200_v36 = vadd.f32 %v2199_v33, %v2198_v31  ;;  %v2112_v51 = vadd.f32 %v2111_v49, %v2110_v46 }
 0x1a4   : > { %v1120_v38 = vadd.f32 %v2200_v36, %v2088_v44 }
 0x1a6   : > { %v2201_v22 = vpop.f32.mrb[36].mxu1  ;;  %v1215_v40 = vpack.c.bf16 %v1120_v38, %v1117_v35  ;;  %v2113_v58 = vpop.f32.mrb[36].mxu0 }
 0x1a7   : > { %v2202_v41 = vpop.f32.mrb[37].mxu1  ;;  %v2114_v44 = vpop.f32.mrb[37].mxu0 }
 0x1a8   : > { %v2203_v47 = vadd.f32 %v2202_v41, %v2201_v22  ;;  %v2204_v48 = vpop.f32.mrb[38].mxu1  ;;  %2315 = vmatprep.mubr.bf16.mxu0 %v1215_v40  ;;  %v2115_v61 = vadd.f32 %v2114_v44, %v2113_v58  ;;  %v2116_v1 = vpop.f32.mrb[38].mxu0 }
 0x1a9   : > { %v2205_v50 = vpop.f32.mrb[39].mxu1  ;;  %v2117_v6 = vpop.f32.mrb[39].mxu0 }
 0x1aa   : > { %v1125_v53 = vadd.f32 %v2203_v47, %v2091_v55  ;;  %v2206_v54 = vadd.f32 %v2205_v50, %v2204_v48  ;;  %v2118_v7 = vadd.f32 %v2117_v6, %v2116_v1 }
 0x1ac   : > { %v1128_v56 = vadd.f32 %v2206_v54, %v2094_v63 }
 0x1ae   : > { %v2207_v37 = vpop.f32.mrb[40].mxu1  ;;  %v1216_v59 = vpack.c.bf16 %v1128_v56, %v1125_v53  ;;  %v2119_v13 = vpop.f32.mrb[40].mxu0 }
 0x1af   : > { %v2208_v60 = vpop.f32.mrb[41].mxu1  ;;  %v2120_v63 = vpop.f32.mrb[41].mxu0 }
 0x1b0   : > { %v2209_v2 = vadd.f32 %v2208_v60, %v2207_v37  ;;  %v2210_v3 = vpop.f32.mrb[42].mxu1  ;;  %2316 = vmatmul.mubr.bf16.gmra.mrb[56].mxu0 %v1216_v59  ;;  %v2121_v18 = vadd.f32 %v2120_v63, %v2119_v13  ;;  %v2122_v20 = vpop.f32.mrb[42].mxu0 }
 0x1b1   : > { %v2211_v62 = vpop.f32.mrb[43].mxu1  ;;  %v2123_v24 = vpop.f32.mrb[43].mxu0 }
 0x1b2   : > { %v1133_v4 = vadd.f32 %v2209_v2, %v2097_v9  ;;  %v2212_v8 = vadd.f32 %v2211_v62, %v2210_v3  ;;  %v2124_v25 = vadd.f32 %v2123_v24, %v2122_v20 }
 0x1b4   : > { %v1136_v11 = vadd.f32 %v2212_v8, %v2100_v19 }
 0x1b6   : > { %v2213_v55 = vpop.f32.mrb[44].mxu1  ;;  %v1217_v14 = vpack.c.bf16 %v1136_v11, %v1133_v4  ;;  %v2125_v30 = vpop.f32.mrb[44].mxu0 }
 0x1b7   : > { %v2214_v15 = vpop.f32.mrb[45].mxu1  ;;  %v2126_v19 = vpop.f32.mrb[45].mxu0 }
 0x1b8   : > { %v2215_v21 = vadd.f32 %v2214_v15, %v2213_v55  ;;  %v2216_v23 = vpop.f32.mrb[46].mxu1  ;;  %2319 = vmatprep.mubr.bf16.mxu0 %v1217_v14  ;;  %v2127_v33 = vadd.f32 %v2126_v19, %v2125_v30  ;;  %v2128_v35 = vpop.f32.mrb[46].mxu0 }
 0x1b9   : > { %v2217_v10 = vpop.f32.mrb[47].mxu1  ;;  %v2129_v39 = vpop.f32.mrb[47].mxu0 }
 0x1ba   : > { %v1141_v16 = vadd.f32 %v2215_v21, %v2103_v27  ;;  %v2218_v26 = vadd.f32 %v2217_v10, %v2216_v23  ;;  %v2130_v40 = vadd.f32 %v2129_v39, %v2128_v35 }
 0x1bc   : > { %v1144_v29 = vadd.f32 %v2218_v26, %v2106_v34 }
 0x1be   : > { %v2219_v9 = vpop.f32.mrb[48].mxu1  ;;  %v1218_v31 = vpack.c.bf16 %v1144_v29, %v1141_v16 }
 0x1bf   : > { %v2220_v32 = vpop.f32.mrb[49].mxu1 }
 0x1c0   : > { %v2221_v36 = vadd.f32 %v2220_v32, %v2219_v9  ;;  %v2222_v38 = vpop.f32.mrb[50].mxu1  ;;  %2320 = vmatmul.mubr.bf16.gmra.mrb[60].mxu0 %v1218_v31 }
 0x1c1   : > { %v2223_v22 = vpop.f32.mrb[51].mxu1 }
 0x1c2   : > { %v1149_v28 = vadd.f32 %v2221_v36, %v2109_v43  ;;  %v2224_v41 = vadd.f32 %v2223_v22, %v2222_v38 }
 0x1c4   : > { %v1152_v46 = vadd.f32 %v2224_v41, %v2112_v51 }
 0x1c6   : > { %v2225_v47 = vpop.f32.mrb[52].mxu1  ;;  %v1219_v27 = vpack.c.bf16 %v1152_v46, %v1149_v28 }
 0x1c7   : > { %v2226_v48 = vpop.f32.mrb[53].mxu1 }
 0x1c8   : > { %v2227_v34 = vadd.f32 %v2226_v48, %v2225_v47  ;;  %v2228_v49 = vpop.f32.mrb[54].mxu1  ;;  %2323 = vmatprep.mubr.bf16.mxu0 %v1219_v27 }
 0x1c9   : > { %v2229_v50 = vpop.f32.mrb[55].mxu1 }
 0x1ca   : > { %v1157_v53 = vadd.f32 %v2227_v34, %v2115_v61  ;;  %v2230_v54 = vadd.f32 %v2229_v50, %v2228_v49 }
 0x1cc   : > { %v1160_v56 = vadd.f32 %v2230_v54, %v2118_v7 }
 0x1ce   : > { %v2231_v58 = vpop.f32.mrb[56].mxu1  ;;  %v1220_v37 = vpack.c.bf16 %v1160_v56, %v1157_v53 }
 0x1cf   : > { %v2232_v59 = vpop.f32.mrb[57].mxu1 }
 0x1d0   : > { %v2233_v44 = vadd.f32 %v2232_v59, %v2231_v58  ;;  %v2234_v60 = vpop.f32.mrb[58].mxu1  ;;  %2324 = vmatmul.mubr.bf16.gmra.mrb[64].mxu0 %v1220_v37 }
 0x1d1   : > { %v2235_v1 = vpop.f32.mrb[59].mxu1 }
 0x1d2   : > { %v1165_v43 = vadd.f32 %v2233_v44, %v2121_v18  ;;  %v2236_v2 = vadd.f32 %v2235_v1, %v2234_v60 }
 0x1d4   : > { %v1168_v51 = vadd.f32 %v2236_v2, %v2124_v25 }
 0x1d6   : > { %v2237_v3 = vpop.f32.mrb[60].mxu1  ;;  %v1221_v6 = vpack.c.bf16 %v1168_v51, %v1165_v43 }
 0x1d7   : > { %v2238_v62 = vpop.f32.mrb[61].mxu1 }
 0x1d8   : > { %v2239_v4 = vadd.f32 %v2238_v62, %v2237_v3  ;;  %v2240_v8 = vpop.f32.mrb[62].mxu1  ;;  %2327 = vmatprep.mubr.bf16.mxu0 %v1221_v6 }
 0x1d9   : > { %v2241_v11 = vpop.f32.mrb[63].mxu1 }
 0x1da   : > { %v1173_v61 = vadd.f32 %v2239_v4, %v2127_v33  ;;  %v2242_v13 = vadd.f32 %v2241_v11, %v2240_v8 }
 0x1dc   : > { %v1176_v7 = vadd.f32 %v2242_v13, %v2130_v40 }
 0x1de   : > { %v2243_v55 = vpop.f32.mrb[64].mxu1  ;;  %v1222_v14 = vpack.c.bf16 %v1176_v7, %v1173_v61 }
 0x1df   : > { %v2244_v63 = vpop.f32.mrb[65].mxu1 }
 0x1e0   : > { %v2245_v15 = vadd.f32 %v2244_v63, %v2243_v55  ;;  %v2246_v20 = vpop.f32.mrb[66].mxu1  ;;  %2328 = vmatmul.mubr.bf16.gmra.mrb[68].mxu0 %v1222_v14 }
 0x1e1   : > { %v2247_v21 = vpop.f32.mrb[67].mxu1 }
 0x1e2   : > { %v1181_v18 = vadd.f32 %v2245_v15, %v3007_v42  ;;  %v2248_v23 = vadd.f32 %v2247_v21, %v2246_v20 }
 0x1e4   : > { %v1184_v24 = vadd.f32 %v2248_v23, %v3009_v45 }
 0x1e6   : > { %v2249_v10 = vpop.f32.mrb[68].mxu1  ;;  %v1223_v25 = vpack.c.bf16 %v1184_v24, %v1181_v18 }
 0x1e7   : > { %v2250_v16 = vpop.f32.mrb[69].mxu1 }
 0x1e8   : > { %v2251_v26 = vadd.f32 %v2250_v16, %v2249_v10  ;;  %v2252_v29 = vpop.f32.mrb[70].mxu1  ;;  %2331 = vmatprep.mubr.bf16.mxu0 %v1223_v25 }
 0x1e9   : > { %v2253_v30 = vpop.f32.mrb[71].mxu1 }
 0x1ea   : > { %v1189_v9 = vadd.f32 %v2251_v26, %v3011_v52  ;;  %v2254_v31 = vadd.f32 %v2253_v30, %v2252_v29 }
 0x1ec   : > { %v1192_v19 = vadd.f32 %v2254_v31, %v3013_v57 }
 0x1ee   : > { %v2255_v32 = vpop.f32.mrb[72].mxu1  ;;  %v1224_v33 = vpack.c.bf16 %v1192_v19, %v1189_v9 }
 0x1ef   : > { %v2256_v35 = vpop.f32.mrb[73].mxu1 }
 0x1f0   : > { %v2257_v36 = vadd.f32 %v2256_v35, %v2255_v32  ;;  %v2258_v42 = vpop.f32.mrb[74].mxu1  ;;  %2332 = vmatmul.mubr.bf16.gmra.mrb[72].mxu0 %v1224_v33 }
 0x1f1   : > { %v2259_v38 = vpop.f32.mrb[75].mxu1 }
 0x1f2   : > { %v1197_v45 = vadd.f32 %v2257_v36, %v3015_v0  ;;  %v2260_v39 = vadd.f32 %v2259_v38, %v2258_v42  ;;  %v3034_v0 = vld [vmem:[%s3141_s3] ss:$0 sm:$0xff] }
 0x1f4   : > { %v1200_v22 = vadd.f32 %v2260_v39, %v3017_v5 }
 0x1f6   : > { %v2261_v40 = vpop.f32.mrb[76].mxu1  ;;  %v1225_v28 = vpack.c.bf16 %v1200_v22, %v1197_v45 }
 0x1f7   : > { %v2262_v41 = vpop.f32.mrb[77].mxu1 }
 0x1f8   : > { %v2263_v52 = vadd.f32 %v2262_v41, %v2261_v40  ;;  %v2264_v46 = vpop.f32.mrb[78].mxu1  ;;  %2335 = vmatprep.mubr.bf16.mxu0 %v1225_v28 }
 0x1f9   : > { %v2265_v57 = vpop.f32.mrb[79].mxu1 }
 0x1fa   : > { %v1205_v47 = vadd.f32 %v2263_v52, %v3019_v12  ;;  %v2266_v27 = vadd.f32 %v2265_v57, %v2264_v46 }
 0x1fc   : > { %v1208_v48 = vadd.f32 %v2266_v27, %v3021_v17 }
 0x1fe   : > { %v1226_v34 = vpack.c.bf16 %v1208_v48, %v1205_v47 }
 0x200   : > { %2336 = vmatmul.mubr.bf16.gmra.mrb[76].mxu0 %v1226_v34 }
 0x263   : > { %v2309_v5 = vpop.f32.mrb[48].mxu0 }
 0x264   : > { %v1341_v49 = vadd.f32 %v2309_v5, %v3034_v0  ;;  %v1332_v50 = vpop.f32.mrb[49].mxu0 }
 0x265   : > { %v1333_v53 = vadd.f32 %v3034_v0, %v1332_v50  ;;  %v2310_v54 = vpop.f32.mrb[50].mxu0 }
 0x266   : > { %v1344_v12 = vadd.f32 %v2310_v54, %v3034_v0  ;;  %v1335_v56 = vpop.f32.mrb[51].mxu0  ;;  %v1461_v58 = vmax.f32 %v1341_v49, 0.0 }
 0x267   : > { %v1336_v17 = vadd.f32 %v3034_v0, %v1335_v56  ;;  %v1459_v59 = vmax.f32 %v1333_v53, 0.0 }
 0x268   : > { %v1462_v37 = vmax.f32 %v1344_v12, 0.0 }
 0x269   : > { %v1460_v44 = vmax.f32 %v1336_v17, 0.0 }
 0x26a   : > { %v1956_v60 = vpack.c.bf16 %v1462_v37, %v1461_v58 }
 0x26b   : > { %v1951_v1 = vpack.c.bf16 %v1460_v44, %v1459_v59 }
 0x26c   : > { %2028 = vst [vmem:[%s3041_s30 + $0x8] sm:$0xff] %v1956_v60  }
 0x26d   : > { %1952 = vst [vmem:[%s3041_s30] sm:$0xff] %v1951_v1  }
 0x273   : > { %v2313_v43 = vpop.f32.mrb[52].mxu0 }
 0x274   : > { %v1357_v2 = vadd.f32 %v2313_v43, %v3034_v0  ;;  %v1348_v51 = vpop.f32.mrb[53].mxu0 }
 0x275   : > { %v1349_v3 = vadd.f32 %v3034_v0, %v1348_v51  ;;  %v2314_v6 = vpop.f32.mrb[54].mxu0 }
 0x276   : > { %v1360_v62 = vadd.f32 %v2314_v6, %v3034_v0  ;;  %v1351_v4 = vpop.f32.mrb[55].mxu0  ;;  %v1465_v11 = vmax.f32 %v1357_v2, 0.0 }
 0x277   : > { %v1352_v8 = vadd.f32 %v3034_v0, %v1351_v4  ;;  %v1463_v13 = vmax.f32 %v1349_v3, 0.0 }
 0x278   : > { %v1466_v61 = vmax.f32 %v1360_v62, 0.0 }
 0x279   : > { %v1464_v7 = vmax.f32 %v1352_v8, 0.0 }
 0x27a   : > { %v1966_v55 = vpack.c.bf16 %v1466_v61, %v1465_v11 }
 0x27b   : > { %v1961_v14 = vpack.c.bf16 %v1464_v7, %v1463_v13 }
 0x27c   : > { %2030 = vst [vmem:[%s3041_s30 + $0x18] sm:$0xff] %v1966_v55  }
 0x27d   : > { %2029 = vst [vmem:[%s3041_s30 + $0x10] sm:$0xff] %v1961_v14  }
 0x283   : > { %v2317_v63 = vpop.f32.mrb[56].mxu0 }
 0x284   : > { %v1373_v15 = vadd.f32 %v2317_v63, %v3034_v0  ;;  %v1364_v20 = vpop.f32.mrb[57].mxu0 }
 0x285   : > { %v1365_v21 = vadd.f32 %v3034_v0, %v1364_v20  ;;  %v2318_v18 = vpop.f32.mrb[58].mxu0 }
 0x286   : > { %v1376_v23 = vadd.f32 %v2318_v18, %v3034_v0  ;;  %v1367_v24 = vpop.f32.mrb[59].mxu0  ;;  %v1469_v25 = vmax.f32 %v1373_v15, 0.0 }
 0x287   : > { %v1368_v10 = vadd.f32 %v3034_v0, %v1367_v24  ;;  %v1467_v26 = vmax.f32 %v1365_v21, 0.0 }
 0x288   : > { %v1470_v16 = vmax.f32 %v1376_v23, 0.0 }
 0x289   : > { %v1468_v29 = vmax.f32 %v1368_v10, 0.0 }
 0x28a   : > { %v1976_v30 = vpack.c.bf16 %v1470_v16, %v1469_v25 }
 0x28b   : > { %v1971_v9 = vpack.c.bf16 %v1468_v29, %v1467_v26 }
 0x28c   : > { %2032 = vst [vmem:[%s3041_s30 + $0x28] sm:$0xff] %v1976_v30  }
 0x28d   : > { %2031 = vst [vmem:[%s3041_s30 + $0x20] sm:$0xff] %v1971_v9  }
 0x293   : > { %v2321_v31 = vpop.f32.mrb[60].mxu0 }
 0x294   : > { %v1389_v19 = vadd.f32 %v2321_v31, %v3034_v0  ;;  %v1380_v32 = vpop.f32.mrb[61].mxu0 }
 0x295   : > { %v1381_v33 = vadd.f32 %v3034_v0, %v1380_v32  ;;  %v2322_v35 = vpop.f32.mrb[62].mxu0 }
 0x296   : > { %v1392_v36 = vadd.f32 %v2322_v35, %v3034_v0  ;;  %v1383_v42 = vpop.f32.mrb[63].mxu0  ;;  %v1473_v45 = vmax.f32 %v1389_v19, 0.0 }
 0x297   : > { %v1384_v38 = vadd.f32 %v3034_v0, %v1383_v42  ;;  %v1471_v22 = vmax.f32 %v1381_v33, 0.0 }
 0x298   : > { %v1474_v39 = vmax.f32 %v1392_v36, 0.0 }
 0x299   : > { %v1472_v40 = vmax.f32 %v1384_v38, 0.0 }
 0x29a   : > { %v1986_v28 = vpack.c.bf16 %v1474_v39, %v1473_v45 }
 0x29b   : > { %v1981_v41 = vpack.c.bf16 %v1472_v40, %v1471_v22 }
 0x29c   : > { %2034 = vst [vmem:[%s3041_s30 + $0x38] sm:$0xff] %v1986_v28  }
 0x29d   : > { %2033 = vst [vmem:[%s3041_s30 + $0x30] sm:$0xff] %v1981_v41  }
 0x2a3   : > { %v2325_v52 = vpop.f32.mrb[64].mxu0 }
 0x2a4   : > { %v1405_v46 = vadd.f32 %v2325_v52, %v3034_v0  ;;  %v1396_v57 = vpop.f32.mrb[65].mxu0 }
 0x2a5   : > { %v1397_v47 = vadd.f32 %v3034_v0, %v1396_v57  ;;  %v2326_v27 = vpop.f32.mrb[66].mxu0 }
 0x2a6   : > { %v1408_v48 = vadd.f32 %v2326_v27, %v3034_v0  ;;  %v1399_v34 = vpop.f32.mrb[67].mxu0  ;;  %v1477_v49 = vmax.f32 %v1405_v46, 0.0 }
 0x2a7   : > { %v1400_v5 = vadd.f32 %v3034_v0, %v1399_v34  ;;  %v1475_v53 = vmax.f32 %v1397_v47, 0.0 }
 0x2a8   : > { %v1478_v50 = vmax.f32 %v1408_v48, 0.0 }
 0x2a9   : > { %v1476_v54 = vmax.f32 %v1400_v5, 0.0 }
 0x2aa   : > { %v1996_v12 = vpack.c.bf16 %v1478_v50, %v1477_v49 }
 0x2ab   : > { %v1991_v56 = vpack.c.bf16 %v1476_v54, %v1475_v53 }
 0x2ac   : > { %2036 = vst [vmem:[%s3041_s30 + $0x48] sm:$0xff] %v1996_v12  }
 0x2ad   : > { %2035 = vst [vmem:[%s3041_s30 + $0x40] sm:$0xff] %v1991_v56  }
 0x2b3   : > { %v2329_v17 = vpop.f32.mrb[68].mxu0 }
 0x2b4   : > { %v1421_v58 = vadd.f32 %v2329_v17, %v3034_v0  ;;  %v1412_v37 = vpop.f32.mrb[69].mxu0 }
 0x2b5   : > { %v1413_v59 = vadd.f32 %v3034_v0, %v1412_v37  ;;  %v2330_v44 = vpop.f32.mrb[70].mxu0 }
 0x2b6   : > { %v1424_v60 = vadd.f32 %v2330_v44, %v3034_v0  ;;  %v1415_v1 = vpop.f32.mrb[71].mxu0  ;;  %v1481_v2 = vmax.f32 %v1421_v58, 0.0 }
 0x2b7   : > { %v1416_v43 = vadd.f32 %v3034_v0, %v1415_v1  ;;  %v1479_v3 = vmax.f32 %v1413_v59, 0.0 }
 0x2b8   : > { %v1482_v51 = vmax.f32 %v1424_v60, 0.0 }
 0x2b9   : > { %v1480_v6 = vmax.f32 %v1416_v43, 0.0 }
 0x2ba   : > { %v2006_v62 = vpack.c.bf16 %v1482_v51, %v1481_v2 }
 0x2bb   : > { %v2001_v4 = vpack.c.bf16 %v1480_v6, %v1479_v3 }
 0x2bc   : > { %2038 = vst [vmem:[%s3041_s30 + $0x58] sm:$0xff] %v2006_v62  }
 0x2bd   : > { %2037 = vst [vmem:[%s3041_s30 + $0x50] sm:$0xff] %v2001_v4  }
 0x2c3   : > { %v2333_v8 = vpop.f32.mrb[72].mxu0 }
 0x2c4   : > { %v1437_v11 = vadd.f32 %v2333_v8, %v3034_v0  ;;  %v1428_v61 = vpop.f32.mrb[73].mxu0 }
 0x2c5   : > { %v1429_v13 = vadd.f32 %v3034_v0, %v1428_v61  ;;  %v2334_v7 = vpop.f32.mrb[74].mxu0 }
 0x2c6   : > { %v1440_v55 = vadd.f32 %v2334_v7, %v3034_v0  ;;  %v1431_v14 = vpop.f32.mrb[75].mxu0  ;;  %v1485_v15 = vmax.f32 %v1437_v11, 0.0 }
 0x2c7   : > { %v1432_v63 = vadd.f32 %v3034_v0, %v1431_v14  ;;  %v1483_v21 = vmax.f32 %v1429_v13, 0.0 }
 0x2c8   : > { %v1486_v20 = vmax.f32 %v1440_v55, 0.0 }
 0x2c9   : > { %v1484_v18 = vmax.f32 %v1432_v63, 0.0 }
 0x2ca   : > { %v2016_v23 = vpack.c.bf16 %v1486_v20, %v1485_v15 }
 0x2cb   : > { %v2011_v24 = vpack.c.bf16 %v1484_v18, %v1483_v21 }
 0x2cc   : > { %2040 = vst [vmem:[%s3041_s30 + $0x68] sm:$0xff] %v2016_v23  }
 0x2cd   : > { %2039 = vst [vmem:[%s3041_s30 + $0x60] sm:$0xff] %v2011_v24  }
 0x2d3   : > { %v2337_v10 = vpop.f32.mrb[76].mxu0 }
 0x2d4   : > { %v1453_v25 = vadd.f32 %v2337_v10, %v3034_v0  ;;  %v1444_v16 = vpop.f32.mrb[77].mxu0 }
 0x2d5   : > { %v1445_v26 = vadd.f32 %v3034_v0, %v1444_v16  ;;  %v2338_v29 = vpop.f32.mrb[78].mxu0 }
 0x2d6   : > { %v1456_v30 = vadd.f32 %v2338_v29, %v3034_v0  ;;  %v1447_v9 = vpop.f32.mrb[79].mxu0  ;;  %v1489_v19 = vmax.f32 %v1453_v25, 0.0 }
 0x2d7   : > { %v1448_v31 = vadd.f32 %v3034_v0, %v1447_v9  ;;  %v1487_v33 = vmax.f32 %v1445_v26, 0.0 }
 0x2d8   : > { %v1490_v32 = vmax.f32 %v1456_v30, 0.0 }
 0x2d9   : > { %v1488_v35 = vmax.f32 %v1448_v31, 0.0 }
 0x2da   : > { %v2026_v36 = vpack.c.bf16 %v1490_v32, %v1489_v19 }
 0x2db   : > { %v2021_v42 = vpack.c.bf16 %v1488_v35, %v1487_v33 }
 0x2dc   : > { %2042 = vst [vmem:[%s3041_s30 + $0x78] sm:$0xff] %v2026_v36  }
 0x2dd   : > { %2041 = vst [vmem:[%s3041_s30 + $0x70] sm:$0xff] %v2021_v42  }
 0x2de   : > { %2663 = shalt.err (!%p2660_p2)
}
 0x2df   : > { %s2664_s8 = scalar_lea.hbm %s3090_s28, 2048  ;;  %s2668_s21 = scalar_lea.hbm %s3142_s4, 4096 }
 0x2e0   : > { %p2665_p13 = scmp.ne.s32.totalorder %s3090_s28, %s2664_s8  ;;  %p2669_p4 = scmp.lt.u32.totalorder %s3090_s28, %s3142_s4 }
 0x2e1   : > { %p2670_p5 = scmp.lt.u32.totalorder %s2668_s21, %s2664_s8  ;;  %p2672_p11 = scmp.lt.u32.totalorder %s2664_s8, %s3090_s28 }
 0x2e2   : > { %p2666_p6 = pnand %p2665_p13, %p3156_p0 }
 0x2e3   : > { %p2671_p8 = por %p2670_p5, %p2669_p4 }
 0x2e4   : > { %p2667_p10 = pneg %p2666_p6 }
 0x2e5   : > { %p2673_p1 = por %p2672_p11, %p2671_p8 }
 0x2e7   : > { %p2674_p3 = pnand %p2673_p1, %p2667_p10 }
 0x2e9   : > { %2677 = shalt.err (!%p2674_p3)
}
 0x2ea   : > { %s2730_s30 = smov 64   ;;  %s2731_s5 = smov 4  }
 0x2eb   : > { %2365 = dma.vmem_to_hbm [thread:$0]  (%p3156_p0), %s3092_s6, 2048, %s3090_s28, %s1652_s19, %s2730_s30, %s2730_s30, %s2731_s5  }
 0x2ec PF: > { %s1680_s24 = sand.u32 1, %s2708_s15   ;;  %p3157_p7 = scmp.ne.s32.totalorder %s3147_s22, 0 }
 0x2ed   : > { %p3158_p9 = scmp.ge.s32.totalorder %s2720_s18, 2  ;;  %s1681_s20 = scalar_lea.sflag [#allocation4], %s1680_s24 }
 0x2ef   : > { %p2379_p12 = pnand %p3158_p9, %p3157_p7 }
 0x2f1   : > { %2703 = dma.done.wait (!%p2379_p12), %s1681_s20, 2048  }
 0x2f2   : > { %2705 = vsyncadd (!%p2379_p12), %s1681_s20, 4294965248  ;;  %p18_p2 = scmp.ge.s32.totalorder %s2867_s9, 4   ;;  %s3159_s15 = smov %s2712_s16 }
 0x2f3   : > { %s3160_s16 = smov %s2716_s17  ;;  %s3161_s17 = smov %s2883_s14 }
 0x2f4   : > { %s3162_s18 = smov %s2867_s9  ;;  %20 = sbr.rel (!%p18_p2) target bundleno = 6 (0x6), region = 89 }
 0x2fb   :  { %1686 = vsyncpa [#allocation3], 1 }
 0x2fc   :  { %1688 = vsyncpa [#allocation3 + $0x1], 1 }
 0x2fd   :  { %1689 = vsyncpa [#allocation6], 1 }
 0x2fe   :  { %1690 = vsyncpa [#allocation4], 1 }
 0x2ff   :  { %1692 = vsyncpa [#allocation4 + $0x1], 1 }

</bundles_post_ra>
